<compile_context>
chip_gen: v5e
topology: v5e:2x2
jax: 0.10.0
libtpu: 0.0.40
codegen_flags: <defaults>
</compile_context>

<pallas_src>
import functools
import math

import jax
import jax.numpy as jnp
import numpy as np
from jax.experimental import pallas as pl
from jax.experimental.pallas import tpu as pltpu


def _rope_kernel(cos_ref, sin_ref, x_ref, o_ref, *, head_dim):
    # cos_ref / sin_ref view: (TS, L)        L = G * head_dim lanes
    #   cos duplicated across the two halves of each head segment,
    #   sin with the second half negated (sign baked in the wrapper).
    # x_ref / o_ref view:     (TS, Hg, L)
    half = head_dim // 2
    lanes = x_ref.shape[-1]

    x = x_ref[...]

    if lanes == head_dim:
        # One head per lane group: a single XLU rotation swaps the halves
        # (shift == head_dim // 2, so rotation direction is irrelevant).
        x_swapped = pltpu.roll(x, shift=half, axis=2)
    else:
        # G heads packed along the lane axis: per-head half swap expressed as
        # two XLU rolls + a lane select.  For in-head lane r:
        #   r <  half -> x[l + half]   (fwd roll)
        #   r >= half -> x[l - half]   (bwd roll)
        fwd = pltpu.roll(x, shift=lanes - half, axis=2)   # fwd[l] = x[(l + half) % L]
        bwd = pltpu.roll(x, shift=half, axis=2)           # bwd[l] = x[(l - half) % L]
        lane = jax.lax.broadcasted_iota(jnp.int32, (1, 1, lanes), 2)
        x_swapped = jnp.where((lane % head_dim) < half, fwd, bwd)

    # Broadcast tables over the head axis.  This should lower to a stride-0
    # sublane-broadcast reuse, not a materialized (TS, Hg, L) temp; with the
    # lane-packed layout Hg is small (often 1) so the cost is negligible
    # either way.
    cos = cos_ref[...][:, None, :]
    sin = sin_ref[...][:, None, :]

    # first half:  x1*cos + x2*sin ; second half: x2*cos - x1*sin
    o_ref[...] = (x * cos + x_swapped * sin).astype(o_ref.dtype)


def rope_forward(x, base=10000.0, seq_tile=None):
    """Pallas RoPE forward. x: (B, S, H, D) with D even."""
    B, S, H, D = x.shape
    assert D % 2 == 0, "RoPE head dim must be even"

    # ---- lane-dense head packing for D < 128 -------------------------------
    if D < 128 and 128 % D == 0:
        G = math.gcd(128 // D, H)      # heads packed into one 128-lane group
    else:
        G = 1
    Hg, L = H // G, G * D
    x_packed = x.reshape(B, S, Hg, L)  # contiguous merge -> free reshape

    # ---- cos/sin tables, computed once in the wrapper ----------------------
    inv_freq = 1.0 / (base ** (jnp.arange(0, D, 2, dtype=jnp.float32) / D))
    angles = jnp.arange(S, dtype=jnp.float32)[:, None] * inv_freq[None, :]  # (S, D//2)
    cos = jnp.cos(angles)
    sin = jnp.sin(angles)
    cos_full = jnp.concatenate([cos, cos], axis=-1)    # (S, D)
    sin_full = jnp.concatenate([sin, -sin], axis=-1)   # (S, D), sign baked in
    if G > 1:
        cos_full = jnp.tile(cos_full, (1, G))          # (S, L)
        sin_full = jnp.tile(sin_full, (1, G))
    # Half-width tables in the input dtype: halves table DMA traffic and vreg
    # pressure for bf16 inputs (native bf16 VALU on v6e/v7x; v5e promotes but
    # keeps the DMA saving).  f32 inputs keep exact f32 tables.
    table_dtype = x.dtype
    cos_full = cos_full.astype(table_dtype)
    sin_full = sin_full.astype(table_dtype)

    # ---- generation-aware seq tile from a VMEM budget -----------------------
    try:
        vmem_cap = int(pltpu.get_tpu_info().vmem_capacity_bytes)
    except Exception:
        vmem_cap = 64 * 1024 * 1024
    # v7x (64 MiB/TC) -> 48 MiB limit; v5e/v6e (128 MiB) -> 64 MiB limit.
    vmem_limit = int(min(vmem_cap * 3 // 4, 64 * 1024 * 1024))
    budget = (vmem_limit * 17) // 20   # headroom for Mosaic internal scratch

    x_b = int(np.dtype(x.dtype).itemsize)
    t_b = int(np.dtype(table_dtype).itemsize)
    # Double-buffered bytes per seq row: x in + x out + cos + sin.
    per_row = 2 * (2 * Hg * L * x_b + 2 * L * t_b)
    TS = max(1, budget // per_row)
    if seq_tile is not None:
        TS = min(TS, int(seq_tile))
    TS = min(TS, 2048)                 # diminishing returns past a few MiB/step
    if TS >= S:
        TS = S                         # full seq -> block == array dim (legal)
    else:
        TS = max(8, (TS // 8) * 8)     # keep the (8,128) sublane rule for tables

    # Seq-tile axis outermost so the table block index is constant across the
    # inner batch loop (re-fetch elided by the pipeline).
    grid = (pl.cdiv(S, TS), B)

    out = pl.pallas_call(
        functools.partial(_rope_kernel, head_dim=D),
        out_shape=jax.ShapeDtypeStruct((B, S, Hg, L), x.dtype),
        grid=grid,
        in_specs=[
            pl.BlockSpec((TS, L), lambda s, b: (s, 0)),                 # cos table
            pl.BlockSpec((TS, L), lambda s, b: (s, 0)),                 # sin table
            pl.BlockSpec((None, TS, Hg, L), lambda s, b: (b, s, 0, 0)), # x tile
        ],
        out_specs=pl.BlockSpec((None, TS, Hg, L), lambda s, b: (b, s, 0, 0)),
        compiler_params=pltpu.CompilerParams(
            dimension_semantics=("parallel", "parallel"),
            vmem_limit_bytes=vmem_limit,
        ),
    )(cos_full, sin_full, x_packed)

    return out.reshape(B, S, H, D)


def rope_reference(x, base=10000.0):
    """Pure-JAX reference reproducing the PyTorch module exactly."""
    B, S, H, D = x.shape
    half = D // 2
    inv_freq = 1.0 / (base ** (jnp.arange(0, D, 2, dtype=jnp.float32) / D))
    seq_idx = jnp.arange(S, dtype=jnp.float32)
    angles = jnp.outer(seq_idx, inv_freq)             # (S, half)
    cos = jnp.cos(angles)[None, :, None, :]           # (1, S, 1, half)
    sin = jnp.sin(angles)[None, :, None, :]
    x1 = x[..., :half]
    x2 = x[..., half:]
    y1 = x1 * cos + x2 * sin
    y2 = x2 * cos - x1 * sin
    return jnp.concatenate([y1, y2], axis=-1)


if __name__ == "__main__":
    key = jax.random.PRNGKey(0)
    k1, k2, k3, k4 = jax.random.split(key, 4)

    # 1) Module-scale shape: lane-packed path (G=4 -> 128 dense lanes).
    x1 = jax.random.normal(k1, (2, 8, 4, 32), dtype=jnp.float32)
    o1 = jax.block_until_ready(rope_forward(x1))
    np.testing.assert_allclose(np.asarray(o1), np.asarray(rope_reference(x1)),
                               rtol=1e-5, atol=1e-5)

    # 2) Multi-tile seq grid with a partial final tile (S % TS != 0).
    x2 = jax.random.normal(k2, (1, 200, 4, 32), dtype=jnp.float32)
    o2 = jax.block_until_ready(rope_forward(x2, seq_tile=128))
    np.testing.assert_allclose(np.asarray(o2), np.asarray(rope_reference(x2)),
                               rtol=1e-5, atol=1e-5)

    # 3) Heads not divisible by the packing factor -> natural-layout fallback.
    x3 = jax.random.normal(k3, (2, 16, 3, 32), dtype=jnp.float32)
    o3 = jax.block_until_ready(rope_forward(x3))
    np.testing.assert_allclose(np.asarray(o3), np.asarray(rope_reference(x3)),
                               rtol=1e-5, atol=1e-5)

    # 4) Production-like bf16 path, D=128 (single head per lane group, bf16
    #    tables) -- compared against the f32 reference with bf16 tolerance.
    x4 = jax.random.normal(k4, (1, 64, 8, 128), dtype=jnp.bfloat16)
    o4 = jax.block_until_ready(rope_forward(x4))
    np.testing.assert_allclose(np.asarray(o4).astype(np.float32),
                               np.asarray(rope_reference(x4.astype(jnp.float32))),
                               rtol=5e-2, atol=8e-2)

    print("KERNEL_OK")
</pallas_src>

<mosaic_0001>
module attributes {stable_mosaic.version = 11 : i64} {
  func.func @_rope_kernel(%arg0: i32, %arg1: i32, %arg2: memref<8x128xf32, #tpu.memory_space<vmem>>, %arg3: memref<8x128xf32, #tpu.memory_space<vmem>>, %arg4: memref<1x8x1x128xf32, #tpu.memory_space<vmem>>, %arg5: memref<1x8x1x128xf32, #tpu.memory_space<vmem>>) attributes {dimension_semantics = [#tpu.dimension_semantics<parallel>, #tpu.dimension_semantics<parallel>], iteration_bounds = array<i64: 1, 2>, scalar_prefetch = 0 : i64, scratch_operands = 0 : i64, tpu.core_type = #tpu.core_type<tc>, window_params = [{transform_indices = @transform_0, window_bounds = array<i64: 8, 128>}, {transform_indices = @transform_1, window_bounds = array<i64: 8, 128>}, {transform_indices = @transform_2, window_bounds = array<i64: 1, 8, 1, 128>}, {transform_indices = @transform_3, window_bounds = array<i64: 1, 8, 1, 128>}]} {
    %c0 = arith.constant 0 : index
    %c0_0 = arith.constant 0 : index
    %c0_1 = arith.constant 0 : index
    %c0_2 = arith.constant 0 : index
    %0 = vector.load %arg4[%c0, %c0_0, %c0_1, %c0_2] : memref<1x8x1x128xf32, #tpu.memory_space<vmem>>, vector<1x8x1x128xf32>
    %1 = vector.shape_cast %0 : vector<1x8x1x128xf32> to vector<8x1x128xf32>
    %c112_i32 = arith.constant 112 : i32
    %2 = tpu.dynamic_rotate %1 by %c112_i32 dim 2 : vector<8x1x128xf32>, i32 -> vector<8x1x128xf32>
    %c16_i32 = arith.constant 16 : i32
    %3 = tpu.dynamic_rotate %1 by %c16_i32 dim 2 : vector<8x1x128xf32>, i32 -> vector<8x1x128xf32>
    %4 = tpu.iota {dimensions = array<i32: 2>} : vector<1x1x128xi32>
    %c32_i32 = arith.constant 32 : i32
    %c0_i32 = arith.constant 0 : i32
    %5 = arith.cmpi eq, %c32_i32, %c0_i32 : i32
    %c1_i32 = arith.constant 1 : i32
    %6 = arith.select %5, %c1_i32, %c32_i32 : i32
    %7 = vector.broadcast %6 : i32 to vector<1x1x128xi32>
    %8 = arith.remsi %4, %7 : vector<1x1x128xi32>
    %c0_i32_3 = arith.constant 0 : i32
    %9 = vector.broadcast %c0_i32_3 : i32 to vector<1x1x128xi32>
    %10 = arith.cmpi ne, %8, %9 : vector<1x1x128xi32>
    %c0_i32_4 = arith.constant 0 : i32
    %11 = vector.broadcast %c0_i32_4 : i32 to vector<1x1x128xi32>
    %12 = arith.cmpi slt, %8, %11 : vector<1x1x128xi32>
    %c0_i32_5 = arith.constant 0 : i32
    %13 = arith.cmpi slt, %6, %c0_i32_5 : i32
    %14 = vector.broadcast %13 : i1 to vector<1x1x128xi1>
    %15 = vector.broadcast %14 : vector<1x1x128xi1> to vector<1x1x128xi1>
    %16 = arith.xori %12, %15 : vector<1x1x128xi1>
    %17 = arith.andi %16, %10 : vector<1x1x128xi1>
    %18 = vector.broadcast %6 : i32 to vector<1x1x128xi32>
    %19 = arith.addi %8, %18 : vector<1x1x128xi32>
    %20 = arith.select %17, %19, %8 : vector<1x1x128xi1>, vector<1x1x128xi32>
    %c16_i32_6 = arith.constant 16 : i32
    %21 = vector.broadcast %c16_i32_6 : i32 to vector<1x1x128xi32>
    %22 = arith.cmpi slt, %20, %21 : vector<1x1x128xi32>
    %23 = vector.shape_cast %22 : vector<1x1x128xi1> to vector<1x1x128xi1>
    %24 = vector.broadcast %23 : vector<1x1x128xi1> to vector<8x1x128xi1>
    %25 = arith.select %24, %2, %3 : vector<8x1x128xi1>, vector<8x1x128xf32>
    %c0_7 = arith.constant 0 : index
    %c0_8 = arith.constant 0 : index
    %26 = vector.load %arg2[%c0_7, %c0_8] : memref<8x128xf32, #tpu.memory_space<vmem>>, vector<8x128xf32>
    %27 = vector.shape_cast %26 : vector<8x128xf32> to vector<8x1x128xf32>
    %c0_9 = arith.constant 0 : index
    %c0_10 = arith.constant 0 : index
    %28 = vector.load %arg3[%c0_9, %c0_10] : memref<8x128xf32, #tpu.memory_space<vmem>>, vector<8x128xf32>
    %29 = vector.shape_cast %28 : vector<8x128xf32> to vector<8x1x128xf32>
    %30 = arith.mulf %1, %27 : vector<8x1x128xf32>
    %31 = arith.mulf %25, %29 : vector<8x1x128xf32>
    %32 = arith.addf %30, %31 : vector<8x1x128xf32>
    %c0_11 = arith.constant 0 : index
    %c0_12 = arith.constant 0 : index
    %c0_13 = arith.constant 0 : index
    %c0_14 = arith.constant 0 : index
    %33 = vector.load %arg5[%c0_11, %c0_12, %c0_13, %c0_14] : memref<1x8x1x128xf32, #tpu.memory_space<vmem>>, vector<1x8x1x128xf32>
    %34 = vector.shape_cast %33 : vector<1x8x1x128xf32> to vector<8x1x128xf32>
    %35 = vector.shape_cast %32 : vector<8x1x128xf32> to vector<1x8x1x128xf32>
    tpu.vector_store %arg5[%c0_11, %c0_12, %c0_13, %c0_14], %35 {strides = array<i32>} : memref<1x8x1x128xf32, #tpu.memory_space<vmem>>, vector<1x8x1x128xf32>,
    return
  }
  func.func @transform_0(%arg0: i32, %arg1: i32) -> (i32, i32) {
    %c0_i32 = arith.constant 0 : i32
    %c0_i32_0 = arith.constant 0 : i32
    return %arg0, %c0_i32 : i32, i32
  }
  func.func @transform_1(%arg0: i32, %arg1: i32) -> (i32, i32) {
    %c0_i32 = arith.constant 0 : i32
    %c0_i32_0 = arith.constant 0 : i32
    return %arg0, %c0_i32 : i32, i32
  }
  func.func @transform_2(%arg0: i32, %arg1: i32) -> (i32, i32, i32, i32) {
    %c0_i32 = arith.constant 0 : i32
    %c0_i32_0 = arith.constant 0 : i32
    %c0_i32_1 = arith.constant 0 : i32
    return %arg1, %arg0, %c0_i32, %c0_i32_0 : i32, i32, i32, i32
  }
  func.func @transform_3(%arg0: i32, %arg1: i32) -> (i32, i32, i32, i32) {
    %c0_i32 = arith.constant 0 : i32
    %c0_i32_0 = arith.constant 0 : i32
    %c0_i32_1 = arith.constant 0 : i32
    return %arg1, %arg0, %c0_i32, %c0_i32_0 : i32, i32, i32, i32
  }
}

</mosaic_0001>

<bundles_post_ra>
// kernel: tpu_custom_call.1
= control target key start
LH: loop header
LB: loop body
LE: loop exit
PB: predicated region body
PF: predicated region fallthrough
CT: control target
= control target key end

     0   :  { %s1069_s0 = inlined_call_operand.hbm [shape: f32[8,128], index: 0, kind: input, shape index: {}]   ;;  %s1070_s1 = inlined_call_operand.hbm [shape: f32[8,128], index: 1, kind: input, shape index: {}]   ;;  %s1071_s2 = inlined_call_operand.hbm [shape: f32[2,8,1,128], index: 2, kind: input, shape index: {}]   ;;  %s1072_s3 = inlined_call_operand.hbm [shape: f32[2,8,1,128], index: 3, kind: output, shape index: {}]  }
   0x1   :  { %1073 = sst [smem:[#allocation13_spill]] %s1069_s0 }
   0x2   :  { %8 = vsyncpa [#allocation3], 0 }
   0x3   :  { %9 = vsyncpa [#allocation6], 0 }
   0x4   :  { %10 = vsyncpa [#allocation4], 0 }
   0x5   :  { %12 = vsyncpa [#allocation4 + $0x1], 0  ;;  %s819_s12 = smov 0   ;;  %s821_s13 = smov 0  }
   0x6   :  { %s823_s14 = smov 0   ;;  %s825_s15 = smov 0  }
   0x7   :  { %s827_s16 = smov 0   ;;  %s829_s17 = smov 0  }
   0x8 LB: > { %s850_s18 = sadd.s32 4294967295, %s790_s17   ;;  %s506_s19 = sadd.s32 4294967294, %s790_s17   ;;  %s790_s17 = sphi %s829_s17, %s18_s17   ;;  %s786_s16 = sphi %s827_s16, %s1087_s16   ;;  %s782_s15 = sphi %s825_s15, %s1086_s15   ;;  %s778_s14 = sphi %s823_s14, %s1085_s14   ;;  %s774_s13 = sphi %s821_s13, %s1084_s13   ;;  %s770_s12 = sphi %s819_s12, %s1083_s12  }
   0x9   : > { %s91_s20 = sadd.s32 1, %s778_s14  ;;  %p98_p0 = scmp.ne.s32.totalorder %s778_s14, %s774_s13 }
   0xa   : > { %p99_p1 = scmp.eq.s32.totalorder %s790_s17, 0  ;;  %p104_p2 = scmp.ne.s32.totalorder %s774_s13, %s770_s12 }
   0xb   : > { %p105_p3 = scmp.eq.s32.totalorder %s850_s18, 0  ;;  %p130_p4 = scmp.eq.s32.totalorder %s850_s18, 1 }
   0xc   : > { %p861_p5 = por %p99_p1, %p98_p0  ;;  %p136_p6 = scmp.eq.s32.totalorder %s506_s19, 1 }
   0xd   : > { %p867_p7 = por %p105_p3, %p104_p2  ;;  %p871_p8 = por %p130_p4, %p98_p0 }
   0xe   : > { %p875_p9 = por %p136_p6, %p104_p2  ;;  %p507_p10 = scmp.ge.s32.totalorder %s790_s17, 1 }
   0xf   : > { %p143_p11 = scmp.lt.s32.totalorder %s790_s17, 3  ;;  %s1078_s0 = sld [smem:[#allocation13_spill]] }
  0x10   : > { %s792_s29 = smov [#allocation2]   ;;  %p510_p13 = scmp.ge.s32.totalorder %s790_s17, 2 }
  0x11   : > { %p884_p12 = pnand %p507_p10, %p143_p11  ;;  %s159_s30 = sshll.u32 %s792_s29, 4  ;;  %s160_s30 = int_to_ptr.vmem [resolvable:$true] %s159_s30 }
  0x12   : > { %p551_p1 = scmp.lt.s32.totalorder %s790_s17, 2  ;;  %s171_s6 = sshll.u32 %s1070_s1, 4  ;;  %s172_s6 = int_to_ptr.hbm [resolvable:$true] %s171_s6 }
  0x13   : > { %p534_p0 = pneg %p884_p12  ;;  %s793_s8 = smov [#allocation5]  }
  0x14   : > { %p899_p4 = pnand %p551_p1, %p861_p5  ;;  %s173_s9 = sshll.u32 %s793_s8, 4  ;;  %s174_s9 = int_to_ptr.vmem [resolvable:$true] %s173_s9 }
  0x15   : > { %s157_s27 = sshll.u32 %s1078_s0, 4  ;;  %p535_p2 = pnand %p534_p0, %p105_p3  ;;  %s158_s27 = int_to_ptr.hbm [resolvable:$true] %s157_s27 }
  0x16   : > { %s184_s10 = sand.u32 1, %s790_s17   ;;  %s27_s11 = sadd.s32 1, %s786_s16 }
  0x17   : > { %537 = dma.hbm_to_vmem [thread:$0]  (!%p535_p2), %s158_s27, 128, %s160_s30, [#allocation3]  }
  0x18   : > { %540 = dma.hbm_to_vmem [thread:$0]  (!%p535_p2), %s172_s6, 128, %s174_s9, [#allocation6]  }
  0x19   : > { %s186_s19 = sand.u32 1, %s778_s14   ;;  %p28_p6 = scmp.ge.s32.totalorder %s27_s11, 2 }
  0x1a   : > { %s511_s25 = sshll.u32 %s186_s19, 3  ;;  %s512_s26 = sshll.u32 %s786_s16, 3 }
  0x1b   : > { %s1089_s11 = smov (%p28_p6, %s27_s11), 0  ;;  %s194_s4 = scalar_lea.hbm %s1071_s2, %s512_s26 }
  0x1c   : > { %s188_s5 = scalar_lea.vmem [#allocation7], %s511_s25  ;;  %s86_s30 = ssub.s32 %s786_s16, %s1089_s11 }
  0x1d   : > { %s197_s27 = sshll.u32 %s188_s5, 4  ;;  %s195_s6 = sshll.u32 %s194_s4, 4  ;;  %s196_s6 = int_to_ptr.hbm [resolvable:$true] %s195_s6  ;;  %s198_s27 = int_to_ptr.vmem [resolvable:$true] %s197_s27 }
  0x1e   : > { %p89_p5 = scmp.eq.s32.totalorder %s86_s30, 0  ;;  %s185_s9 = scalar_lea.sflag [#allocation3], %s184_s10 }
  0x1f   : > { %s794_s19 = smov 16   ;;  %s795_s0 = smov 1  }
  0x20   : > { %s917_s8 = scalar_select %p89_p5, %s778_s14, %s91_s20  }
  0x21   : > { %544 = dma.hbm_to_vmem [thread:$0]  (!%p899_p4), %s196_s6, 128, %s198_s27, %s185_s9, %s794_s19, %s794_s19, %s795_s0  }
  0x22   : > { %209 = sbr.rel (%p884_p12) target bundleno = 211 (0xd3), region = 32 }
  0x27   : > { %753 = dma.done.wait (%p105_p3), [#allocation3], 128  }
  0x28   : > { %755 = vsyncadd (%p105_p3), [#allocation3], 4294967168 }
  0x29   : > { %757 = dma.done.wait (%p105_p3), [#allocation6], 128  }
  0x2a   : > { %759 = vsyncadd (%p105_p3), [#allocation6], 4294967168  ;;  %s221_s0 = sand.u32 1, %s850_s18   ;;  %s223_s20 = sand.u32 1, %s774_s13  }
  0x2b   : > { %s935_s28 = sshll.u32 %s223_s20, 3  ;;  %s222_s7 = scalar_lea.sflag [#allocation3], %s221_s0 }
  0x2c   : > { %s225_s10 = scalar_lea.vmem [#allocation7], %s935_s28 }
  0x2d   : > { %761 = dma.done.wait (%p867_p7), %s222_s7, 128  }
  0x2e   : > { %763 = vsyncadd (%p867_p7), %s222_s7, 4294967168  ;;  %v942_v0 = vld [vmem:[%s225_s10 + $0x2] sm:$0x1]  ;;  %v251_v1 = vld [vmem:[%s225_s10] sm:$0x1]  ;;  %s796_s25 = smov 112   ;;  %v291_v10 = vlaneseq }
  0x2f   : > { %263 = vrot.lane.b32.xlu1 %v942_v0, %s796_s25  ;;  %259 = vrot.lane.b32.xlu0 %v251_v1, %s796_s25  ;;  %v945_v2 = vld [vmem:[%s225_s10 + $0x4] sm:$0x1]  ;;  %v254_v3 = vld [vmem:[%s225_s10 + $0x3] sm:$0x1]  ;;  %s797_s18 = smov 16   ;;  %v970_v14 = vld [vmem:[#allocation2] sm:$0xff] }
  0x30   : > { %267 = vrot.lane.b32.xlu2 %v945_v2, %s796_s25  ;;  %v252_v4 = vld [vmem:[%s225_s10 + $0x1] sm:$0x1]  ;;  %v948_v5 = vld [vmem:[%s225_s10 + $0x5] sm:$0x1]  ;;  %v951_v6 = vld [vmem:[%s225_s10 + $0x7] sm:$0x1]  ;;  %v348_v17 = vmul.f32 %v970_v14, %v251_v1 }
  0x31   : > { %v257_v7 = vld [vmem:[%s225_s10 + $0x6] sm:$0x1]  ;;  %v292_v11 = vand.u32 127, %v291_v10  ;;  %v976_v16 = vld [vmem:[#allocation5] sm:$0xff]  ;;  %v320_v22 = vrot.slane %v970_v14, 3  ;;  %s984_s22 = scalar_lea.vmem [#allocation8], %s935_s28 }
  0x32   : > { %v336_v25 = vrot.slane %v976_v16, 3  ;;  %v323_v31 = vrot.slane %v970_v14, 6  ;;  %v339_v34 = vrot.slane %v976_v16, 6  ;;  %v319_v40 = vrot.slane %v970_v14, 2  ;;  %s519_s26 = sshll.u32 %s782_s15, 3  ;;  %s394_s5 = sshll.u32 %s984_s22, 4  ;;  %s395_s5 = int_to_ptr.vmem [resolvable:$true] %s394_s5 }
  0x33   : > { %v297_v13 = vand.u32 31, %v292_v11  ;;  %v351_v26 = vmul.f32 %v320_v22, %v254_v3  ;;  %v318_v41 = vrot.slane %v970_v14, 1  ;;  %v335_v43 = vrot.slane %v976_v16, 2  ;;  %s393_s4 = scalar_lea.hbm %s1072_s3, %s519_s26  ;;  %s381_s27 = scalar_lea.sflag [#allocation4], %s223_s20 }
  0x34   : > { %v354_v35 = vmul.f32 %v323_v31, %v257_v7  ;;  %v334_v44 = vrot.slane %v976_v16, 1  ;;  %v350_v45 = vmul.f32 %v319_v40, %v942_v0  ;;  %v321_v53 = vrot.slane %v970_v14, 4  ;;  %s396_s15 = sshll.u32 %s393_s4, 4  ;;  %s720_s0 = scalar_lea.hbm %s1072_s3, 16  ;;  %s397_s15 = int_to_ptr.hbm [resolvable:$true] %s396_s15 }
  0x35   : > { %vm972_vm0 = vcmp.lt.s32.totalorder %v297_v13, 16  ;;  %v349_v46 = vmul.f32 %v318_v41, %v252_v4  ;;  %v322_v54 = vrot.slane %v970_v14, 5  ;;  %v338_v57 = vrot.slane %v976_v16, 5  ;;  %s714_s30 = sshra.s32 %s397_s15, 4  ;;  %s715_s30 = int_to_ptr.hbm [resolvable:$true] %s714_s30 }
  0x36   : > { %v337_v58 = vrot.slane %v976_v16, 4  ;;  %v352_v59 = vmul.f32 %v321_v53, %v945_v2  ;;  %s716_s6 = scalar_lea.hbm %s715_s30, 8  ;;  %p721_p11 = scmp.lt.s32.totalorder %s715_s30, %s1072_s3 }
  0x37   : > { %265 = vrot.lane.b32.xlu1 %v254_v3, %s796_s25  ;;  %261 = vrot.lane.b32.xlu0 %v252_v4, %s796_s25  ;;  %v353_v60 = vmul.f32 %v322_v54, %v948_v5  ;;  %p717_p3 = scmp.ne.s32.totalorder %s715_s30, %s716_s6  ;;  %p722_p12 = scmp.lt.s32.totalorder %s720_s0, %s716_s6 }
  0x38   : > { %269 = vrot.lane.b32.xlu2 %v948_v5, %s796_s25 }
  0x39   : > { %p718_p7 = pnand %p717_p3, %p871_p8  ;;  %p723_p0 = por %p722_p12, %p721_p11 }
  0x3b   : > { %p719_p10 = pneg %p718_p7 }
  0x3d   : > { %p724_p1 = pnand %p723_p0, %p719_p10 }
  0x3f   : > { %273 = vrot.lane.b32.xlu1 %v951_v6, %s796_s25  ;;  %271 = vrot.lane.b32.xlu0 %v257_v7, %s796_s25 }
  0x40   : > { %275 = vrot.lane.b32.xlu2 %v251_v1, %s797_s18 }
  0x47   : > { %279 = vrot.lane.b32.xlu1 %v942_v0, %s797_s18  ;;  %277 = vrot.lane.b32.xlu0 %v252_v4, %s797_s18  ;;  %v324_v4 = vrot.slane %v970_v14, 7 }
  0x48   : > { %281 = vrot.lane.b32.xlu2 %v254_v3, %s797_s18 }
  0x4f   : > { %285 = vrot.lane.b32.xlu1 %v948_v5, %s797_s18  ;;  %283 = vrot.lane.b32.xlu0 %v945_v2, %s797_s18 }
  0x50   : > { %287 = vrot.lane.b32.xlu2 %v257_v7, %s797_s18  ;;  %v340_v7 = vrot.slane %v976_v16, 7 }
  0x57   : > { %289 = vrot.lane.b32.xlu0 %v951_v6, %s797_s18 }
  0x8a   : > { %v966_v8 = vpop.permute.xlu2 %267 }
  0x92   : > { %v968_v9 = vpop.permute.xlu2 %269 }
  0x9a   : > { %v276_v12 = vpop.permute.xlu2 %275 }
  0xa1   : > { %v264_v18 = vpop.permute.xlu1 %263  ;;  %v260_v19 = vpop.permute.xlu0 %259 }
  0xa2   : > { %v308_v20 = vsel %vm972_vm0, %v260_v19, %v276_v12  ;;  %v282_v24 = vpop.permute.xlu2 %281 }
  0xa3   : > { %v356_v21 = vmul.f32 %v976_v16, %v308_v20 }
  0xa5   : > { %v364_v23 = vadd.f32 %v356_v21, %v348_v17 }
  0xa7   : > { %372 = vst [vmem:[%s984_s22] sm:$0x1] %v364_v23 }
  0xa9   : > { %v266_v27 = vpop.permute.xlu1 %265  ;;  %v262_v28 = vpop.permute.xlu0 %261 }
  0xaa   : > { %v311_v29 = vsel %vm972_vm0, %v266_v27, %v282_v24  ;;  %v288_v33 = vpop.permute.xlu2 %287 }
  0xab   : > { %v359_v30 = vmul.f32 %v336_v25, %v311_v29 }
  0xad   : > { %v367_v32 = vadd.f32 %v359_v30, %v351_v26 }
  0xaf   : > { %375 = vst [vmem:[%s984_s22 + $0x3] sm:$0x1] %v367_v32 }
  0xb1   : > { %v274_v36 = vpop.permute.xlu1 %273  ;;  %v272_v37 = vpop.permute.xlu0 %271 }
  0xb2   : > { %v314_v38 = vsel %vm972_vm0, %v272_v37, %v288_v33 }
  0xb3   : > { %v362_v39 = vmul.f32 %v339_v34, %v314_v38 }
  0xb5   : > { %v370_v42 = vadd.f32 %v362_v39, %v354_v35 }
  0xb7   : > { %378 = vst [vmem:[%s984_s22 + $0x6] sm:$0x1] %v370_v42 }
  0xb9   : > { %v280_v47 = vpop.permute.xlu1 %279  ;;  %v278_v48 = vpop.permute.xlu0 %277 }
  0xba   : > { %v310_v49 = vsel %vm972_vm0, %v264_v18, %v280_v47  ;;  %v309_v50 = vsel %vm972_vm0, %v262_v28, %v278_v48 }
  0xbb   : > { %v358_v51 = vmul.f32 %v335_v43, %v310_v49  ;;  %v357_v52 = vmul.f32 %v334_v44, %v309_v50 }
  0xbd   : > { %v366_v55 = vadd.f32 %v358_v51, %v350_v45  ;;  %v365_v56 = vadd.f32 %v357_v52, %v349_v46 }
  0xbf   : > { %374 = vst [vmem:[%s984_s22 + $0x2] sm:$0x1] %v366_v55 }
  0xc0   : > { %373 = vst [vmem:[%s984_s22 + $0x1] sm:$0x1] %v365_v56 }
  0xc1   : > { %v286_v61 = vpop.permute.xlu1 %285  ;;  %v284_v62 = vpop.permute.xlu0 %283 }
  0xc2   : > { %v313_v63 = vsel %vm972_vm0, %v968_v9, %v286_v61  ;;  %v312_v0 = vsel %vm972_vm0, %v966_v8, %v284_v62  ;;  %v355_v8 = vmul.f32 %v324_v4, %v951_v6 }
  0xc3   : > { %v361_v1 = vmul.f32 %v338_v57, %v313_v63  ;;  %v360_v3 = vmul.f32 %v337_v58, %v312_v0 }
  0xc5   : > { %v369_v2 = vadd.f32 %v361_v1, %v353_v60  ;;  %v368_v5 = vadd.f32 %v360_v3, %v352_v59 }
  0xc7   : > { %377 = vst [vmem:[%s984_s22 + $0x5] sm:$0x1] %v369_v2 }
  0xc8   : > { %376 = vst [vmem:[%s984_s22 + $0x4] sm:$0x1] %v368_v5 }
  0xc9   : > { %v290_v9 = vpop.permute.xlu0 %289 }
  0xca   : > { %v315_v10 = vsel %vm972_vm0, %v274_v36, %v290_v9 }
  0xcb   : > { %v363_v11 = vmul.f32 %v340_v7, %v315_v10 }
  0xcd   : > { %v371_v12 = vadd.f32 %v363_v11, %v355_v8 }
  0xcf   : > { %379 = vst [vmem:[%s984_s22 + $0x7] sm:$0x1] %v371_v12 }
  0xd0   : > { %727 = shalt.err (!%p724_p1)
}
  0xd1   : > { %s798_s20 = smov 1  }
  0xd2   : > { %532 = dma.vmem_to_hbm [thread:$0]  (%p871_p8), %s395_s5, 128, %s397_s15, %s381_s27, %s797_s18, %s797_s18, %s798_s20  }
  0xd3 PF: > { %s411_s10 = sand.u32 1, %s770_s12   ;;  %p546_p2 = pnand %p510_p13, %p875_p9 }
  0xd4   : > { %s412_s25 = scalar_lea.sflag [#allocation4], %s411_s10 }
  0xd5   : > { %p547_p4 = pneg %p546_p2 }
  0xd7   : > { %765 = dma.done.wait (%p547_p4), %s412_s25, 128  }
  0xd8   : > { %767 = vsyncadd (%p547_p4), %s412_s25, 4294967168  ;;  %s18_s17 = sadd.s32 1, %s790_s17   ;;  %s1083_s12 = smov %s774_s13 }
  0xd9   : > { %p15_p6 = scmp.ge.s32.totalorder %s18_s17, 4   ;;  %s1084_s13 = smov %s778_s14 }
  0xda   : > { %s1085_s14 = smov %s917_s8  ;;  %s1086_s15 = smov %s786_s16 }
  0xdb   : > { %s1087_s16 = smov %s1089_s11  ;;  %17 = sbr.rel (!%p15_p6) target bundleno = 8 (0x8), region = 86 }
  0xe0   :  { %418 = vsyncpa [#allocation3], 1 }
  0xe1   :  { %420 = vsyncpa [#allocation3 + $0x1], 1 }
  0xe2   :  { %421 = vsyncpa [#allocation6], 1 }
  0xe3   :  { %422 = vsyncpa [#allocation4], 1 }
  0xe4   :  { %424 = vsyncpa [#allocation4 + $0x1], 1 }

</bundles_post_ra>
